<compile_context>
chip_gen: v7x
topology: tpu7x:2x2x1
jax: 0.10.0
libtpu: 0.0.40
codegen_flags: <defaults>
</compile_context>

<pallas_src>
import jax
import jax.numpy as jnp
from jax import lax
from jax.experimental import pallas as pl
from jax.experimental.pallas import tpu as pltpu

_BIG = 1e30  # finite sentinel; b - a stays finite and strictly negative for invalid pairs


def _round_up(x, m):
    return ((x + m - 1) // m) * m


def _margin_ranking_kernel(neg_ref, pos_ref, out_ref, acc_ref):
    # neg_ref: (TQ, 1)    pre-masked negative scores (sublane axis)
    # pos_ref: (1, TP)    pre-masked (margin-folded) positive scores (lane axis)
    # out_ref: (1, 8, 128) lane-dense per-neg-block partial sums (written on last pos step)
    # acc_ref: (8, TP)    small VMEM accumulator, persists across the pos ("arbitrary") axis
    j = pl.program_id(1)
    tq = neg_ref.shape[0]
    tp = pos_ref.shape[1]
    n_slabs = tq // 8

    @pl.when(j == 0)
    def _init():
        acc_ref[...] = jnp.zeros_like(acc_ref)

    # Hoist the sublane broadcast of the lane-dense pos tile out of the slab loop
    # (JAX does not CSE broadcast_in_dim inside loops).
    pos_b = jnp.broadcast_to(pos_ref[...], (8, tp))            # (8, TP)

    def slab_body(s, carry):
        off = pl.multiple_of(s * 8, 8)
        neg_slab = neg_ref[pl.ds(off, 8), :]                   # (8, 1), lane-broadcast
        # hinge = max(0, margin - pos + neg) == max(0, neg - (pos - margin))
        return carry + jnp.maximum(neg_slab - pos_b, 0.0)      # (8, TP) register carry

    partial = lax.fori_loop(
        0, n_slabs, slab_body,
        jnp.zeros((8, tp), jnp.float32),
        unroll=min(8, n_slabs),
    )
    # Single small VMEM RMW per grid step (was a full (TQ, TP) RMW in v1).
    acc_ref[...] += partial

    @pl.when(j == pl.num_programs(1) - 1)
    def _finalize():
        # Fold lane chunks down to one lane-dense (8, 128) slab; the cheap scalar reduce
        # of the tiny partials array happens in the wrapper.
        folded = acc_ref[:, 0:128]
        for c in range(1, tp // 128):
            folded = folded + acc_ref[:, c * 128:(c + 1) * 128]
        out_ref[0] = folded


def margin_ranking_loss(y_true, y_pred, margin=0.1, tq=8192, tp=1024):
    """Pallas implementation of MarginRankingLoss.forward (sum reduction).

    Assumes y_pred contains finite values with |y_pred| << 1e29 (sentinel masking).
    """
    n = int(y_pred.size)
    if n == 0:
        return jnp.float32(0.0)

    yp = y_pred.reshape(-1).astype(jnp.float32)
    yt = y_true.reshape(-1)

    # Pre-mask + fold margin (O(N), done once in the wrapper).
    a = jnp.where(yt == 1, yp - jnp.float32(margin), jnp.float32(_BIG))   # pos / lanes
    b = jnp.where(yt == 0, yp, jnp.float32(-_BIG))                        # neg / sublanes

    # Tile sizes: sublane tile multiple of 8, lane tile multiple of 128; clip to (padded) N.
    tq = _round_up(min(tq, _round_up(n, 8)), 8)
    tp = _round_up(min(tp, _round_up(n, 128)), 128)
    q_pad = _round_up(n, tq)
    p_pad = _round_up(n, tp)

    # Pad tails with sentinels so padded pairs contribute exactly 0.
    a = jnp.pad(a, (0, p_pad - n), constant_values=_BIG).reshape(1, p_pad)
    b = jnp.pad(b, (0, q_pad - n), constant_values=-_BIG).reshape(q_pad, 1)

    nq = q_pad // tq
    np_ = p_pad // tp

    partials = pl.pallas_call(
        _margin_ranking_kernel,
        out_shape=jax.ShapeDtypeStruct((nq, 8, 128), jnp.float32),
        grid_spec=pltpu.PrefetchScalarGridSpec(
            num_scalar_prefetch=0,
            grid=(nq, np_),
            in_specs=[
                pl.BlockSpec((tq, 1), lambda i, j: (i, 0)),    # neg column tile (sublanes)
                pl.BlockSpec((1, tp), lambda i, j: (0, j)),    # pos row tile (lane-dense)
            ],
            out_specs=pl.BlockSpec((1, 8, 128), lambda i, j: (i, 0, 0)),
            scratch_shapes=[pltpu.VMEM((8, tp), jnp.float32)],
        ),
        compiler_params=pltpu.CompilerParams(
            dimension_semantics=("parallel", "arbitrary"),
        ),
    )(b, a)

    return jnp.sum(partials)


def _reference_loss(y_true, y_pred, margin=0.1):
    """Pure-JAX reference mirroring the PyTorch module (sum over valid pos/neg pairs)."""
    yp = y_pred.astype(jnp.float32)
    yt = y_true.astype(jnp.float32)
    pos_mask = (yt == 1.0)[None, :]
    neg_mask = (yt == 0.0)[:, None]
    mat = margin - yp[None, :] + yp[:, None]
    return jnp.sum(jnp.where(pos_mask & neg_mask, jnp.maximum(mat, 0.0), 0.0))


if __name__ == "__main__":
    key = jax.random.PRNGKey(0)
    k1, k2, k3, k4, k5, k6 = jax.random.split(key, 6)

    # Case 1: tiny input, single grid step (tiles clip to (16, 128)).
    n1 = 16
    yp1 = jax.random.uniform(k1, (n1,), dtype=jnp.float32)
    yt1 = (jax.random.uniform(k2, (n1,)) > 0.5).astype(jnp.float32)
    out1 = jax.block_until_ready(margin_ranking_loss(yt1, yp1, margin=0.1))
    ref1 = _reference_loss(yt1, yp1, margin=0.1)
    assert jnp.allclose(out1, ref1, rtol=1e-5, atol=1e-5), (out1, ref1)

    # Case 2: non-aligned N with small explicit tiles -> multi-block grid in both axes,
    # sentinel padding, slab fori_loop, accumulator init/accumulate/finalize paths.
    n2 = 300
    yp2 = jax.random.normal(k3, (n2,), dtype=jnp.float32)
    yt2 = (jax.random.uniform(k4, (n2,)) > 0.4).astype(jnp.float32)
    out2 = jax.block_until_ready(margin_ranking_loss(yt2, yp2, margin=0.25, tq=64, tp=128))
    ref2 = _reference_loss(yt2, yp2, margin=0.25)
    assert jnp.allclose(out2, ref2, rtol=1e-4, atol=1e-3), (out2, ref2)

    # Case 3: default (large) tiles with clipping -> multi-step pos reduction, long slab loop.
    n3 = 1500
    yp3 = jax.random.normal(k5, (n3,), dtype=jnp.float32)
    yt3 = (jax.random.uniform(k6, (n3,)) > 0.5).astype(jnp.float32)
    out3 = jax.block_until_ready(margin_ranking_loss(yt3, yp3, margin=0.1))
    ref3 = _reference_loss(yt3, yp3, margin=0.1)
    assert jnp.allclose(out3, ref3, rtol=5e-4, atol=1e-2), (out3, ref3)

    # Case 4: one class empty -> loss must be exactly 0 (matches the PyTorch early return).
    out4 = jax.block_until_ready(margin_ranking_loss(jnp.ones((n1,), jnp.float32), yp1, margin=0.1))
    assert float(out4) == 0.0, out4

    print("KERNEL_OK")
</pallas_src>

<mosaic_0001>
module attributes {stable_mosaic.version = 11 : i64} {
  func.func @_margin_ranking_kernel(%arg0: i32, %arg1: i32, %arg2: memref<16x1xf32, #tpu.memory_space<vmem>>, %arg3: memref<1x128xf32, #tpu.memory_space<vmem>>, %arg4: memref<1x8x128xf32, #tpu.memory_space<vmem>>, %arg5: memref<8x128xf32, #tpu.memory_space<vmem>>) attributes {dimension_semantics = [#tpu.dimension_semantics<parallel>, #tpu.dimension_semantics<arbitrary>], iteration_bounds = array<i64: 1, 1>, scalar_prefetch = 0 : i64, scratch_operands = 1 : i64, tpu.core_type = #tpu.core_type<tc>, window_params = [{transform_indices = @transform_0, window_bounds = array<i64: 16, 1>}, {transform_indices = @transform_1, window_bounds = array<i64: 1, 128>}, {transform_indices = @transform_2, window_bounds = array<i64: 1, 8, 128>}]} {
    %c0_i32 = arith.constant 0 : i32
    %0 = arith.cmpi eq, %arg1, %c0_i32 : i32
    %1 = arith.extui %0 : i1 to i32
    %c0_i32_0 = arith.constant 0 : i32
    %2 = arith.cmpi ne, %1, %c0_i32_0 : i32
    scf.if %2 {
      %cst_14 = arith.constant 0.000000e+00 : f32
      %31 = vector.broadcast %cst_14 : f32 to vector<8x128xf32>
      %c0_15 = arith.constant 0 : index
      %c0_16 = arith.constant 0 : index
      %32 = vector.load %arg5[%c0_15, %c0_16] : memref<8x128xf32, #tpu.memory_space<vmem>>, vector<8x128xf32>
      tpu.vector_store %arg5[%c0_15, %c0_16], %31 {strides = array<i32>} : memref<8x128xf32, #tpu.memory_space<vmem>>, vector<8x128xf32>,
    } else {
    }
    %c0 = arith.constant 0 : index
    %c0_1 = arith.constant 0 : index
    %3 = vector.load %arg3[%c0, %c0_1] : memref<1x128xf32, #tpu.memory_space<vmem>>, vector<1x128xf32>
    %4 = vector.shape_cast %3 : vector<1x128xf32> to vector<1x128xf32>
    %5 = vector.broadcast %4 : vector<1x128xf32> to vector<8x128xf32>
    %cst = arith.constant 0.000000e+00 : f32
    %6 = vector.broadcast %cst : f32 to vector<8x128xf32>
    %c0_i32_2 = arith.constant 0 : i32
    %c8_i32 = arith.constant 8 : i32
    %7 = arith.muli %c0_i32_2, %c8_i32 : i32
    %8 = tpu.assume_multiple %7, 8 : i32
    %9 = arith.index_cast %8 : i32 to index
    %c0_3 = arith.constant 0 : index
    %10 = vector.load %arg2[%9, %c0_3] : memref<16x1xf32, #tpu.memory_space<vmem>>, vector<8x1xf32>
    %11 = vector.broadcast %10 : vector<8x1xf32> to vector<8x128xf32>
    %12 = arith.subf %11, %5 : vector<8x128xf32>
    %cst_4 = arith.constant 0.000000e+00 : f32
    %13 = vector.broadcast %cst_4 : f32 to vector<8x128xf32>
    %14 = arith.maximumf %12, %13 : vector<8x128xf32>
    %15 = arith.addf %6, %14 : vector<8x128xf32>
    %c1_i32 = arith.constant 1 : i32
    %c8_i32_5 = arith.constant 8 : i32
    %16 = arith.muli %c1_i32, %c8_i32_5 : i32
    %17 = tpu.assume_multiple %16, 8 : i32
    %18 = arith.index_cast %17 : i32 to index
    %c0_6 = arith.constant 0 : index
    %19 = vector.load %arg2[%18, %c0_6] : memref<16x1xf32, #tpu.memory_space<vmem>>, vector<8x1xf32>
    %20 = vector.broadcast %19 : vector<8x1xf32> to vector<8x128xf32>
    %21 = arith.subf %20, %5 : vector<8x128xf32>
    %cst_7 = arith.constant 0.000000e+00 : f32
    %22 = vector.broadcast %cst_7 : f32 to vector<8x128xf32>
    %23 = arith.maximumf %21, %22 : vector<8x128xf32>
    %24 = arith.addf %15, %23 : vector<8x128xf32>
    %c2_i32 = arith.constant 2 : i32
    %c0_8 = arith.constant 0 : index
    %c0_9 = arith.constant 0 : index
    %25 = vector.load %arg5[%c0_8, %c0_9] : memref<8x128xf32, #tpu.memory_space<vmem>>, vector<8x128xf32>
    %26 = arith.addf %25, %24 : vector<8x128xf32>
    %c0_10 = arith.constant 0 : index
    %c0_11 = arith.constant 0 : index
    %27 = vector.load %arg5[%c0_10, %c0_11] : memref<8x128xf32, #tpu.memory_space<vmem>>, vector<8x128xf32>
    tpu.vector_store %arg5[%c0_10, %c0_11], %26 {strides = array<i32>} : memref<8x128xf32, #tpu.memory_space<vmem>>, vector<8x128xf32>,
    %c0_i32_12 = arith.constant 0 : i32
    %28 = arith.cmpi eq, %arg1, %c0_i32_12 : i32
    %29 = arith.extui %28 : i1 to i32
    %c0_i32_13 = arith.constant 0 : i32
    %30 = arith.cmpi ne, %29, %c0_i32_13 : i32
    scf.if %30 {
      %c0_14 = arith.constant 0 : index
      %c0_15 = arith.constant 0 : index
      %31 = vector.load %arg5[%c0_14, %c0_15] : memref<8x128xf32, #tpu.memory_space<vmem>>, vector<8x128xf32>
      %c0_16 = arith.constant 0 : index
      %c0_17 = arith.constant 0 : index
      %c0_18 = arith.constant 0 : index
      %32 = vector.load %arg4[%c0_16, %c0_17, %c0_18] : memref<1x8x128xf32, #tpu.memory_space<vmem>>, vector<1x8x128xf32>
      %33 = vector.shape_cast %32 : vector<1x8x128xf32> to vector<8x128xf32>
      %34 = vector.shape_cast %31 : vector<8x128xf32> to vector<1x8x128xf32>
      tpu.vector_store %arg4[%c0_16, %c0_17, %c0_18], %34 {strides = array<i32>} : memref<1x8x128xf32, #tpu.memory_space<vmem>>, vector<1x8x128xf32>,
    } else {
    }
    return
  }
  func.func @transform_0(%arg0: i32, %arg1: i32) -> (i32, i32) {
    %c0_i32 = arith.constant 0 : i32
    %c0_i32_0 = arith.constant 0 : i32
    return %arg0, %c0_i32 : i32, i32
  }
  func.func @transform_1(%arg0: i32, %arg1: i32) -> (i32, i32) {
    %c0_i32 = arith.constant 0 : i32
    %c0_i32_0 = arith.constant 0 : i32
    return %c0_i32, %arg1 : i32, i32
  }
  func.func @transform_2(%arg0: i32, %arg1: i32) -> (i32, i32, i32) {
    %c0_i32 = arith.constant 0 : i32
    %c0_i32_0 = arith.constant 0 : i32
    %c0_i32_1 = arith.constant 0 : i32
    return %arg0, %c0_i32, %c0_i32_0 : i32, i32, i32
  }
}

</mosaic_0001>

<bundles_post_ra>
// kernel: tpu_custom_call.1
= control target key start
LH: loop header
LB: loop body
LE: loop exit
PB: predicated region body
PF: predicated region fallthrough
CT: control target
= control target key end

     0   :  { %s132_s0 = inlined_call_operand.vmem [shape: f32[16,1], index: 0, kind: input, shape index: {}]   ;;  %s133_s1 = inlined_call_operand.vmem [shape: f32[1,128], index: 1, kind: input, shape index: {}]   ;;  %s134_s2 = inlined_call_operand.hbm [shape: f32[1,8,128], index: 2, kind: output, shape index: {}]  }
   0x1   :  { %v24_v0 = vld [vmem:[%s132_s0] sm:$0xff] }
   0x2   :  { %7 = vsyncpa [#allocation4], 0  ;;  %v94_v1 = vmov 0   ;;  %v66_v2 = vld [vmem:[%s132_s0 + $0x8] sm:$0xff]  ;;  %v65_v4 = vld [vmem:[%s133_s1] ss:$0 sm:$0xff] }
   0x3   :  { %69 = vset.pattern.permute.xlu0 %v94_v1  ;;  %s95_s15 = smov [#allocation3]  }
   0x4   :  { %27 = vperm.xlu0 %69, %v24_v0   ;;  %s57_s16 = sshll.u32 %s95_s15, 4  ;;  %s58_s16 = int_to_ptr.vmem [resolvable:$true] %s57_s16 }
   0x5   :  { %s70_s17 = scalar_lea.vmem %s58_s16, 128  ;;  %p75_p1 = scmp.lt.s32.totalorder %s58_s16, %s58_s16 }
   0x6   :  { %p71_p0 = scmp.ne.s32.totalorder %s58_s16, %s70_s17  ;;  %p76_p2 = scmp.lt.s32.totalorder %s70_s17, %s70_s17 }
   0x8   :  { %37 = vperm.xlu0 %69, %v66_v2   ;;  %p77_p3 = por %p76_p2, %p75_p1 }
   0xa   :  { %p78_p4 = pnand %p77_p3, %p71_p0 }
  0x83   :  { %v28_v3 = vpop.permute.xlu0 %27 }
  0x84   :  { %v30_v5 = vsub.f32 %v28_v3, %v65_v4 }
  0x86   :  { %v31_v8 = vmax.f32 %v30_v5, 0.0 }
  0x87   :  { %v38_v6 = vpop.permute.xlu0 %37 }
  0x88   :  { %v40_v7 = vsub.f32 %v38_v6, %v65_v4 }
  0x8a   :  { %v41_v9 = vmax.f32 %v40_v7, 0.0 }
  0x8c   :  { %v42_v10 = vadd.f32 %v41_v9, %v31_v8 }
  0x8e   :  { %50 = vst [vmem:[#allocation3] sm:$0xff] %v42_v10 }
  0x8f   :  { %81 = shalt.err (!%p78_p4)
}
  0x90   :  { %s82_s1 = scalar_lea.hbm %s134_s2, 128 }
  0x91   :  { %p83_p5 = scmp.ne.s32.totalorder %s134_s2, %s82_s1  ;;  %p86_p6 = scmp.lt.u32.totalorder %s82_s1, %s134_s2 }
  0x93   :  { %p88_p7 = pnand %p86_p6, %p83_p5 }
  0x95   :  { %91 = shalt.err (!%p88_p7)
}
  0x96   :  { %60 = dma.vmem_to_hbm [thread:$0]  %s58_s16, 128, %s134_s2, [#allocation4]  }
  0x97   :  { %92 = dma.done.wait [#allocation4], 128  }
  0x98   :  { %93 = vsyncadd [#allocation4], 4294967168 }
  0x99   :  { %64 = vsyncpa [#allocation4], 1 }

</bundles_post_ra>
